<compile_context>
chip_gen: v6e
topology: v6e:2x2x1
jax: 0.10.0
libtpu: 0.0.40
codegen_flags: <defaults>
</compile_context>

<pallas_src>
import functools

import jax
import jax.numpy as jnp
import numpy as np
from jax.experimental import pallas as pl
from jax.experimental.pallas import tpu as pltpu

_LANE = 128
_SUBLANE = 8          # f32 sublane granularity


def _round_up(n, m):
    return ((n + m - 1) // m) * m


def _pick_tb(batch, hs_j, hs_l, hebb_budget_bytes):
    """Batch-block size: largest multiple-of-8 divisor of `batch` whose resident
    hebb block (x2 pipeline buffers, f32) fits `hebb_budget_bytes`; prefers
    >= 2 blocks so the 'parallel' batch axis can be split across TensorCores
    (v7x megacore).  Falls back to the full batch for tiny/awkward batches."""
    bytes_per_batch_row = 2 * hs_j * hs_l * 4
    cap = min(256, max(8, hebb_budget_bytes // bytes_per_batch_row))
    divisors = [d for d in range(8, min(batch, cap) + 1, 8) if batch % d == 0]
    if not divisors:
        return batch
    if len(divisors) > 1 and divisors[-1] == batch:
        return divisors[-2]           # keep nb >= 2 when possible
    return divisors[-1]


def _device_vmem_capacity_bytes():
    try:
        cap = getattr(pltpu.get_tpu_info(), "vmem_capacity_bytes", None)
        if cap:
            return int(cap)
    except Exception:
        pass
    return 64 * 1024 * 1024           # conservative: v7x per-TensorCore VMEM


def _vmem_limit_bytes(tb, hs_j, hs_l):
    f = 4
    est = (2 * tb * hs_j * hs_l * f                       # resident hebb block (2 bufs)
           + 3 * 2 * tb * hs_l * f                        # i2h in / hid0 in / hid_seq out
           + 2 * (hs_l * hs_l + hs_j * hs_l + 2 * hs_l) * f   # weight blocks (2 bufs)
           + tb * hs_l * f)                               # hidden-state scratch
    cap = int(0.75 * _device_vmem_capacity_bytes())       # headroom for compiler scratch
    return max(min(2 * est + (4 << 20), cap), min(32 << 20, cap))


def _miconi_modplast_seq_kernel(i2h_ref, hid0_ref, hebb0_hbm,
                                w_t_ref, alpha_t_ref, wda_ref, bda_ref,
                                hid_seq_ref, hebb_ref,
                                hid_scr, dma_sem, *, tb, hs_j):
    b = pl.program_id(0)
    t = pl.program_id(1)

    # First timestep of this batch block: bring the carried state on chip.
    # hebb0 lives in HBM (memory_space=ANY) and is copied once per batch block
    # directly into the resident output block.
    @pl.when(t == 0)
    def _init():
        hid_scr[...] = hid0_ref[...]
        cp = pltpu.make_async_copy(hebb0_hbm.at[pl.ds(b * tb, tb)],
                                   hebb_ref, dma_sem.at[0])
        cp.start()
        cp.wait()

    hid = hid_scr[...]                 # (TB, HSl)      lane-major hidden state
    hebb_t = hebb_ref[...]             # (TB, HSj, HSl) = hebb[b, j, i] (transposed)

    # Shared (non-plastic) recurrent weight on the MXU.
    rec_w = jnp.dot(hid, w_t_ref[...], preferred_element_type=jnp.float32)

    # Plastic term  rec_p[b, i] = sum_j alpha[i, j] * hebb[b, i, j] * hid[b, j].
    # With hebb stored transposed (j on sublanes, i on lanes) the sublane
    # reduce produces a 128-lane result directly (no pad / result relayout),
    # and the j dimension only pays round_up(HS, 8) rows.
    hid_col = hid[:, :hs_j, None]                               # (TB, HSj, 1)
    rec_p = jnp.sum(alpha_t_ref[...][None, :, :] * hebb_t * hid_col, axis=1)
    # TODO(synk): if the XLU reduce/relayout binds, move this contraction onto
    # the mostly-idle MXU as a batched matvec (einsum('bj,bji->bi', ...)).

    hactiv = jnp.tanh(i2h_ref[0] + rec_w + rec_p)               # (TB, HSl)

    # Neuromodulator (NBDA == 1, da='tanh'); bias scalar read from SMEM.
    da = jnp.tanh(jnp.sum(hactiv * wda_ref[...], axis=-1, keepdims=True)
                  + bda_ref[0])                                 # (TB, 1)

    # addpw == 3 update with DA folded into hactiv (transposed layout):
    #   hebb[b,j,i] <- clip(hebb[b,j,i] + hid[b,j]*(da*hactiv)[b,i], -1, 1)
    # Kept as a single fused expression -> one store per (8,128) vreg.
    scaled = da * hactiv                                        # (TB, HSl)
    hebb_ref[...] = jnp.clip(hebb_t + hid_col * scaled[:, None, :], -1.0, 1.0)

    hid_seq_ref[0] = hactiv
    hid_scr[...] = hactiv


def miconi_modplast_sequence(xs, hidden, hebb, params, *,
                             hebb_vmem_budget_bytes=24 * 1024 * 1024):
    """Runs T recurrent 'modplast' steps inside one pallas_call.

    xs: (T, B, IS); hidden: (B, HS); hebb: (B, HS, HS) with hebb[b, i, j].
    Returns (hactiv for every step (T, B, HS), final hebb (B, HS, HS)).
    """
    f32 = jnp.float32
    T, B, IS = xs.shape
    HS = hidden.shape[-1]
    HSl = _round_up(HS, _LANE)        # lane (last-dim) padding -> dense stores
    HSj = _round_up(HS, _SUBLANE)     # hebb/alpha j axis only pays the 8 multiple
    pL, pJ = HSl - HS, HSj - HS

    # ---- Input projection hoisted out of the recurrence: one MXU GEMM over
    #      all T*B rows instead of T*nb tiny matmuls on the serial path. ----
    i2h_all = (xs.reshape(T * B, IS).astype(f32) @ params["wi2h"].astype(f32).T
               + params["bi2h"].astype(f32)).reshape(T, B, HS)
    if pL:
        i2h_all = jnp.pad(i2h_all, ((0, 0), (0, 0), (0, pL)))

    hid_p = hidden.astype(f32)
    if pL:
        hid_p = jnp.pad(hid_p, ((0, 0), (0, pL)))

    # Zero padding is semantics-preserving: padded weight rows/cols are zero,
    # so padded hactiv / hebb entries stay exactly zero (tanh(0)=0, clip(0)=0).
    hebb_t = jnp.transpose(hebb.astype(f32), (0, 2, 1))         # [b, j, i]
    if pJ or pL:
        hebb_t = jnp.pad(hebb_t, ((0, 0), (0, pJ), (0, pL)))

    w_t = params["w"].astype(f32).T
    if pL:
        w_t = jnp.pad(w_t, ((0, pL), (0, pL)))
    alpha_t = params["alpha"].astype(f32).T                      # [j, i]
    if pJ or pL:
        alpha_t = jnp.pad(alpha_t, ((0, pJ), (0, pL)))
    wda = params["wda"].astype(f32).reshape(1, HS)
    if pL:
        wda = jnp.pad(wda, ((0, 0), (0, pL)))
    bda = params["bda"].astype(f32).reshape(1)

    TB = _pick_tb(B, HSj, HSl, hebb_vmem_budget_bytes)
    nb = B // TB
    grid = (nb, T)
    kernel = functools.partial(_miconi_modplast_seq_kernel, tb=TB, hs_j=HSj)

    in_specs = [
        pl.BlockSpec((1, TB, HSl), lambda b, t: (t, b, 0)),     # i2h_t
        pl.BlockSpec((TB, HSl), lambda b, t: (b, 0)),           # hidden_0
        pl.BlockSpec(memory_space=pl.ANY),                      # hebb_0 (stays in HBM)
        pl.BlockSpec((HSl, HSl), lambda b, t: (0, 0)),          # w^T
        pl.BlockSpec((HSj, HSl), lambda b, t: (0, 0)),          # alpha^T
        pl.BlockSpec((1, HSl), lambda b, t: (0, 0)),            # W_h2DA (row)
        pl.BlockSpec(memory_space=pltpu.MemorySpace.SMEM),      # b_h2DA scalar
    ]
    # TODO(synk): the constant-index weight blocks (w^T, alpha^T, wda) could be
    # single-buffered via pipeline_mode=pl.Buffered(1) to free more VMEM for TB.
    out_specs = (
        pl.BlockSpec((1, TB, HSl), lambda b, t: (t, b, 0)),     # hactiv per step
        pl.BlockSpec((TB, HSj, HSl), lambda b, t: (b, 0, 0)),   # hebb (resident over t)
    )
    out_shape = (
        jax.ShapeDtypeStruct((T, B, HSl), f32),
        jax.ShapeDtypeStruct((B, HSj, HSl), f32),
    )

    hid_seq, hebb_t_out = pl.pallas_call(
        kernel,
        grid=grid,
        in_specs=in_specs,
        out_specs=out_specs,
        out_shape=out_shape,
        scratch_shapes=[pltpu.VMEM((TB, HSl), f32),             # carried hidden
                        pltpu.SemaphoreType.DMA((1,))],         # hebb_0 load
        input_output_aliases={2: 1},                            # hebb updated in place
        compiler_params=pltpu.CompilerParams(
            dimension_semantics=("parallel", "arbitrary"),
            vmem_limit_bytes=_vmem_limit_bytes(TB, HSj, HSl)),
    )(i2h_all, hid_p, hebb_t, w_t, alpha_t, wda, bda)

    # TODO(synk): on v6e/v7x a bf16 hebb store (f32 accumulate) would halve the
    # dominant tensor; kept f32 everywhere to match the PyTorch reference.
    hid_out = hid_seq[:, :, :HS] if pL else hid_seq
    hebb_out = jnp.transpose(hebb_t_out[:, :HS, :HS], (0, 2, 1))
    return hid_out, hebb_out


def miconi_forward(x, states, params):
    """Mirrors CustomMiconiNetwork.forward for net_type='modplast' (one step)."""
    hidden, hebb, et, pw = states
    hid_seq, hebb_new = miconi_modplast_sequence(x[None], hidden, hebb, params)
    hid_new = hid_seq[0]
    return hid_new, [hid_new, hebb_new, et, pw]


def _ref_step(x, hidden, hebb, p):
    """Pure-JAX reference of the PyTorch forward (modplast / tanh / addpw=3)."""
    i2h = x @ p["wi2h"].T + p["bi2h"]
    weff = p["w"][None] + p["alpha"][None] * hebb
    rec = jnp.einsum("bij,bj->bi", weff, hidden)
    hactiv = jnp.tanh(i2h + rec)
    da = jnp.tanh(hactiv @ p["wda"].T + p["bda"])               # (B, 1)
    deltahebb = hactiv[:, :, None] * hidden[:, None, :]
    hebb_new = jnp.clip(hebb + da[:, :, None] * deltahebb, -1.0, 1.0)
    return hactiv, hebb_new


def init_params(key, input_size, hidden_size, nbda=1):
    """Deterministic synthetic init matching the module's parameter shapes."""
    k = jax.random.split(key, 6)
    bound_i2h = 1.0 / np.sqrt(input_size)
    bound_da = 1.0 / np.sqrt(hidden_size)
    return {
        "wi2h": jax.random.uniform(k[0], (hidden_size, input_size),
                                   minval=-bound_i2h, maxval=bound_i2h,
                                   dtype=jnp.float32),
        "bi2h": jax.random.uniform(k[1], (hidden_size,),
                                   minval=-bound_i2h, maxval=bound_i2h,
                                   dtype=jnp.float32),
        "w": (0.01 * jax.random.uniform(k[2], (hidden_size, hidden_size),
                                        dtype=jnp.float32)).T,
        "alpha": (0.01 * jax.random.uniform(k[3], (hidden_size, hidden_size),
                                            dtype=jnp.float32)).T,
        "wda": jax.random.uniform(k[4], (nbda, hidden_size),
                                  minval=-bound_da, maxval=bound_da,
                                  dtype=jnp.float32),
        "bda": jax.random.uniform(k[5], (nbda,),
                                  minval=-bound_da, maxval=bound_da,
                                  dtype=jnp.float32),
    }


if __name__ == "__main__":
    INPUT_SIZE = 16
    HIDDEN_SIZE = 32
    BATCH = 2
    STEPS = 3

    key = jax.random.PRNGKey(0)
    pkey, xkey, hkey, bkey = jax.random.split(key, 4)
    params = init_params(pkey, INPUT_SIZE, HIDDEN_SIZE)

    def close(a, b):
        return np.allclose(np.asarray(a), np.asarray(b), atol=1e-4, rtol=1e-4)

    ok = True

    # (a) Whole sequence in one kernel call with NON-ZERO initial state so the
    #     plastic read (alpha*hebb) and Hebbian update paths are exercised.
    xs = jax.random.normal(xkey, (STEPS, BATCH, INPUT_SIZE), jnp.float32)
    hidden0 = jnp.tanh(jax.random.normal(hkey, (BATCH, HIDDEN_SIZE), jnp.float32))
    hebb0 = jnp.clip(0.5 * jax.random.normal(
        bkey, (BATCH, HIDDEN_SIZE, HIDDEN_SIZE), jnp.float32), -1.0, 1.0)
    hid_seq, hebb_fin = miconi_modplast_sequence(xs, hidden0, hebb0, params)
    jax.block_until_ready((hid_seq, hebb_fin))
    r_h, r_hebb = hidden0, hebb0
    for t in range(STEPS):
        r_h, r_hebb = _ref_step(xs[t], r_h, r_hebb, params)
        ok &= close(hid_seq[t], r_h)
    ok &= close(hebb_fin, r_hebb)

    # (b) Module-style step-by-step API (states_init zeros, same kernel, T=1).
    zero_h = jnp.zeros((BATCH, HIDDEN_SIZE), jnp.float32)
    zero_m = jnp.zeros((BATCH, HIDDEN_SIZE, HIDDEN_SIZE), jnp.float32)
    states = [zero_h, zero_m, zero_m, zero_m]
    out1, states1 = miconi_forward(xs[0], states, params)
    out2, states2 = miconi_forward(xs[1], states1, params)
    jax.block_until_ready((out2, states2))
    s_h1, s_hebb1 = _ref_step(xs[0], zero_h, zero_m, params)
    s_h2, s_hebb2 = _ref_step(xs[1], s_h1, s_hebb1, params)
    ok &= close(out1, s_h1) and close(states1[1], s_hebb1)
    ok &= close(out2, s_h2) and close(states2[1], s_hebb2)

    # (c) Batch exercising multi-block tiling (B=16 -> TB=8, nb=2): per-block
    #     hebb_0 DMA, in-place aliasing across blocks, parallel batch axis.
    B2, T2 = 16, 2
    k2a, k2b, k2c = jax.random.split(jax.random.PRNGKey(1), 3)
    xs2 = jax.random.normal(k2a, (T2, B2, INPUT_SIZE), jnp.float32)
    h2 = jnp.tanh(jax.random.normal(k2b, (B2, HIDDEN_SIZE), jnp.float32))
    m2 = jnp.clip(0.5 * jax.random.normal(
        k2c, (B2, HIDDEN_SIZE, HIDDEN_SIZE), jnp.float32), -1.0, 1.0)
    hs2, hebb2 = miconi_modplast_sequence(xs2, h2, m2, params)
    jax.block_until_ready((hs2, hebb2))
    rh, rm = h2, m2
    for t in range(T2):
        rh, rm = _ref_step(xs2[t], rh, rm, params)
        ok &= close(hs2[t], rh)
    ok &= close(hebb2, rm)

    # TODO(synk): 'rnn'/'lstm'/'plastic'/'modul' branches and the eval_energy /
    # forward_energy_consumption paths are not kerneled; only the default
    # 'modplast' (da='tanh', addpw=3, NBDA=1) config is implemented.
    assert ok, "Pallas kernel disagrees with the pure-JAX reference"
    print("KERNEL_OK")
</pallas_src>

<mosaic_0001>
module attributes {stable_mosaic.version = 11 : i64} {
  func.func @_miconi_modplast_seq_kernel(%arg0: i32, %arg1: i32, %arg2: memref<1x2x128xf32, #tpu.memory_space<vmem>>, %arg3: memref<2x128xf32, #tpu.memory_space<vmem>>, %arg4: memref<2x32x128xf32, #tpu.memory_space<any>>, %arg5: memref<128x128xf32, #tpu.memory_space<vmem>>, %arg6: memref<32x128xf32, #tpu.memory_space<vmem>>, %arg7: memref<1x128xf32, #tpu.memory_space<vmem>>, %arg8: memref<1xf32, #tpu.memory_space<smem>>, %arg9: memref<1x2x128xf32, #tpu.memory_space<vmem>>, %arg10: memref<2x32x128xf32, #tpu.memory_space<vmem>>, %arg11: memref<2x128xf32, #tpu.memory_space<vmem>>, %arg12: memref<1x!tpu.dma_semaphore, #tpu.memory_space<semaphore_mem>>) attributes {dimension_semantics = [#tpu.dimension_semantics<parallel>, #tpu.dimension_semantics<arbitrary>], iteration_bounds = array<i64: 1, 3>, scalar_prefetch = 0 : i64, scratch_operands = 2 : i64, tpu.core_type = #tpu.core_type<tc>, window_params = [{transform_indices = @transform_0, window_bounds = array<i64: 1, 2, 128>}, {transform_indices = @transform_1, window_bounds = array<i64: 2, 128>}, {}, {pipeline_mode = #tpu.pipeline_mode<synchronous>, transform_indices = @transform_3, window_bounds = array<i64: 128, 128>}, {pipeline_mode = #tpu.pipeline_mode<synchronous>, transform_indices = @transform_4, window_bounds = array<i64: 32, 128>}, {pipeline_mode = #tpu.pipeline_mode<synchronous>, transform_indices = @transform_5, window_bounds = array<i64: 1, 128>}, {transform_indices = @transform_6, window_bounds = array<i64: 1>}, {transform_indices = @transform_7, window_bounds = array<i64: 1, 2, 128>}, {transform_indices = @transform_8, window_bounds = array<i64: 2, 32, 128>}]} {
    %c0_i32 = arith.constant 0 : i32
    %0 = arith.cmpi eq, %arg1, %c0_i32 : i32
    %1 = arith.extui %0 : i1 to i32
    %c0_i32_0 = arith.constant 0 : i32
    %2 = arith.cmpi ne, %1, %c0_i32_0 : i32
    scf.if %2 {
      %c0_27 = arith.constant 0 : index
      %c0_28 = arith.constant 0 : index
      %46 = vector.load %arg3[%c0_27, %c0_28] : memref<2x128xf32, #tpu.memory_space<vmem>>, vector<2x128xf32>
      %c0_29 = arith.constant 0 : index
      %c0_30 = arith.constant 0 : index
      %47 = vector.load %arg11[%c0_29, %c0_30] : memref<2x128xf32, #tpu.memory_space<vmem>>, vector<2x128xf32>
      tpu.vector_store %arg11[%c0_29, %c0_30], %46 {strides = array<i32>} : memref<2x128xf32, #tpu.memory_space<vmem>>, vector<2x128xf32>,
      %c2_i32 = arith.constant 2 : i32
      %48 = arith.muli %arg0, %c2_i32 : i32
      %c0_i32_31 = arith.constant 0 : i32
      %c0_i32_32 = arith.constant 0 : i32
      %c0_i32_33 = arith.constant 0 : i32
      %49 = tpu.memref_slice %arg4[%48, %c0_i32_32, %c0_i32_33] : memref<2x32x128xf32, #tpu.memory_space<any>> -> memref<2x32x128xf32, #tpu.memory_space<any>>
      %50 = tpu.memref_slice %arg12[%c0_i32_31] : memref<1x!tpu.dma_semaphore, #tpu.memory_space<semaphore_mem>> -> memref<1x!tpu.dma_semaphore, #tpu.memory_space<semaphore_mem>>
      %51 = tpu.memref_squeeze %50 : memref<1x!tpu.dma_semaphore, #tpu.memory_space<semaphore_mem>> -> memref<!tpu.dma_semaphore, #tpu.memory_space<semaphore_mem>>
      tpu.enqueue_dma source(%49 : memref<2x32x128xf32, #tpu.memory_space<any>>) target(%arg10 : memref<2x32x128xf32, #tpu.memory_space<vmem>>) target_semaphore(%51 : memref<!tpu.dma_semaphore, #tpu.memory_space<semaphore_mem>>)
      %c0_i32_34 = arith.constant 0 : i32
      %c0_i32_35 = arith.constant 0 : i32
      %c0_i32_36 = arith.constant 0 : i32
      %52 = tpu.memref_slice %arg4[%48, %c0_i32_35, %c0_i32_36] : memref<2x32x128xf32, #tpu.memory_space<any>> -> memref<2x32x128xf32, #tpu.memory_space<any>>
      %53 = tpu.memref_slice %arg12[%c0_i32_34] : memref<1x!tpu.dma_semaphore, #tpu.memory_space<semaphore_mem>> -> memref<1x!tpu.dma_semaphore, #tpu.memory_space<semaphore_mem>>
      %54 = tpu.memref_squeeze %53 : memref<1x!tpu.dma_semaphore, #tpu.memory_space<semaphore_mem>> -> memref<!tpu.dma_semaphore, #tpu.memory_space<semaphore_mem>>
      tpu.wait_dma2 semaphore(%54 : memref<!tpu.dma_semaphore, #tpu.memory_space<semaphore_mem>>) src(%52 : memref<2x32x128xf32, #tpu.memory_space<any>>) dst(%arg10 : memref<2x32x128xf32, #tpu.memory_space<vmem>>)
    } else {
    }
    %c0 = arith.constant 0 : index
    %c0_1 = arith.constant 0 : index
    %3 = vector.load %arg11[%c0, %c0_1] : memref<2x128xf32, #tpu.memory_space<vmem>>, vector<2x128xf32>
    %c0_2 = arith.constant 0 : index
    %c0_3 = arith.constant 0 : index
    %c0_4 = arith.constant 0 : index
    %4 = vector.load %arg10[%c0_2, %c0_3, %c0_4] : memref<2x32x128xf32, #tpu.memory_space<vmem>>, vector<2x32x128xf32>
    %c0_5 = arith.constant 0 : index
    %c0_6 = arith.constant 0 : index
    %5 = vector.load %arg5[%c0_5, %c0_6] : memref<128x128xf32, #tpu.memory_space<vmem>>, vector<128x128xf32>
    %cst = arith.constant dense<0.000000e+00> : vector<2x128xf32>
    %6 = tpu.matmul %3, %5, %cst {dimension_numbers = #tpu.dot_dimension_numbers<[1], [0], [0], [1], [0, 0, 1, 1], [], []>} : vector<2x128xf32>, vector<128x128xf32>, vector<2x128xf32> -> vector<2x128xf32>
    %7 = vector.extract_strided_slice %3 {offsets = [0, 0], sizes = [2, 32], strides = [1, 1]} : vector<2x128xf32> to vector<2x32xf32>
    %8 = vector.shape_cast %7 : vector<2x32xf32> to vector<2x32x1xf32>
    %c0_7 = arith.constant 0 : index
    %c0_8 = arith.constant 0 : index
    %9 = vector.load %arg6[%c0_7, %c0_8] : memref<32x128xf32, #tpu.memory_space<vmem>>, vector<32x128xf32>
    %10 = vector.shape_cast %9 : vector<32x128xf32> to vector<1x32x128xf32>
    %11 = vector.broadcast %10 : vector<1x32x128xf32> to vector<2x32x128xf32>
    %12 = arith.mulf %11, %4 : vector<2x32x128xf32>
    %13 = vector.broadcast %8 : vector<2x32x1xf32> to vector<2x32x128xf32>
    %14 = arith.mulf %12, %13 : vector<2x32x128xf32>
    %cst_9 = arith.constant dense<0.000000e+00> : vector<2x128xf32>
    %15 = vector.multi_reduction <add>, %14, %cst_9 [1] : vector<2x32x128xf32> to vector<2x128xf32>
    %c0_10 = arith.constant 0 : index
    %c0_11 = arith.constant 0 : index
    %c0_12 = arith.constant 0 : index
    %16 = vector.load %arg2[%c0_10, %c0_11, %c0_12] : memref<1x2x128xf32, #tpu.memory_space<vmem>>, vector<1x2x128xf32>
    %17 = vector.shape_cast %16 : vector<1x2x128xf32> to vector<2x128xf32>
    %18 = arith.addf %17, %6 : vector<2x128xf32>
    %19 = arith.addf %18, %15 : vector<2x128xf32>
    %20 = math.tanh %19 : vector<2x128xf32>
    %c0_13 = arith.constant 0 : index
    %c0_14 = arith.constant 0 : index
    %21 = vector.load %arg7[%c0_13, %c0_14] : memref<1x128xf32, #tpu.memory_space<vmem>>, vector<1x128xf32>
    %22 = vector.broadcast %21 : vector<1x128xf32> to vector<2x128xf32>
    %23 = arith.mulf %20, %22 : vector<2x128xf32>
    %cst_15 = arith.constant dense<0.000000e+00> : vector<2xf32>
    %24 = vector.multi_reduction <add>, %23, %cst_15 [1] : vector<2x128xf32> to vector<2xf32>
    %25 = vector.shape_cast %24 : vector<2xf32> to vector<2x1xf32>
    %c0_16 = arith.constant 0 : index
    %26 = memref.load %arg8[%c0_16] : memref<1xf32, #tpu.memory_space<smem>>
    %27 = vector.broadcast %26 : f32 to vector<2x1xf32>
    %28 = arith.addf %25, %27 : vector<2x1xf32>
    %29 = math.tanh %28 : vector<2x1xf32>
    %30 = vector.broadcast %29 : vector<2x1xf32> to vector<2x128xf32>
    %31 = arith.mulf %30, %20 : vector<2x128xf32>
    %32 = vector.shape_cast %31 : vector<2x128xf32> to vector<2x1x128xf32>
    %33 = vector.broadcast %8 : vector<2x32x1xf32> to vector<2x32x128xf32>
    %34 = vector.broadcast %32 : vector<2x1x128xf32> to vector<2x32x128xf32>
    %35 = arith.mulf %33, %34 : vector<2x32x128xf32>
    %36 = arith.addf %4, %35 : vector<2x32x128xf32>
    %cst_17 = arith.constant -1.000000e+00 : f32
    %cst_18 = arith.constant 1.000000e+00 : f32
    %37 = vector.broadcast %cst_17 : f32 to vector<2x32x128xf32>
    %38 = arith.maximumf %37, %36 : vector<2x32x128xf32>
    %39 = vector.broadcast %cst_18 : f32 to vector<2x32x128xf32>
    %40 = arith.minimumf %39, %38 : vector<2x32x128xf32>
    %c0_19 = arith.constant 0 : index
    %c0_20 = arith.constant 0 : index
    %c0_21 = arith.constant 0 : index
    %41 = vector.load %arg10[%c0_19, %c0_20, %c0_21] : memref<2x32x128xf32, #tpu.memory_space<vmem>>, vector<2x32x128xf32>
    tpu.vector_store %arg10[%c0_19, %c0_20, %c0_21], %40 {strides = array<i32>} : memref<2x32x128xf32, #tpu.memory_space<vmem>>, vector<2x32x128xf32>,
    %c0_22 = arith.constant 0 : index
    %c0_23 = arith.constant 0 : index
    %c0_24 = arith.constant 0 : index
    %42 = vector.load %arg9[%c0_22, %c0_23, %c0_24] : memref<1x2x128xf32, #tpu.memory_space<vmem>>, vector<1x2x128xf32>
    %43 = vector.shape_cast %42 : vector<1x2x128xf32> to vector<2x128xf32>
    %44 = vector.shape_cast %20 : vector<2x128xf32> to vector<1x2x128xf32>
    tpu.vector_store %arg9[%c0_22, %c0_23, %c0_24], %44 {strides = array<i32>} : memref<1x2x128xf32, #tpu.memory_space<vmem>>, vector<1x2x128xf32>,
    %c0_25 = arith.constant 0 : index
    %c0_26 = arith.constant 0 : index
    %45 = vector.load %arg11[%c0_25, %c0_26] : memref<2x128xf32, #tpu.memory_space<vmem>>, vector<2x128xf32>
    tpu.vector_store %arg11[%c0_25, %c0_26], %20 {strides = array<i32>} : memref<2x128xf32, #tpu.memory_space<vmem>>, vector<2x128xf32>,
    return
  }
  func.func @transform_0(%arg0: i32, %arg1: i32) -> (i32, i32, i32) {
    %c0_i32 = arith.constant 0 : i32
    %c0_i32_0 = arith.constant 0 : i32
    return %arg1, %arg0, %c0_i32 : i32, i32, i32
  }
  func.func @transform_1(%arg0: i32, %arg1: i32) -> (i32, i32) {
    %c0_i32 = arith.constant 0 : i32
    %c0_i32_0 = arith.constant 0 : i32
    return %arg0, %c0_i32 : i32, i32
  }
  func.func @transform_3(%arg0: i32, %arg1: i32) -> (i32, i32) {
    %c0_i32 = arith.constant 0 : i32
    %c0_i32_0 = arith.constant 0 : i32
    %c0_i32_1 = arith.constant 0 : i32
    return %c0_i32, %c0_i32_0 : i32, i32
  }
  func.func @transform_4(%arg0: i32, %arg1: i32) -> (i32, i32) {
    %c0_i32 = arith.constant 0 : i32
    %c0_i32_0 = arith.constant 0 : i32
    %c0_i32_1 = arith.constant 0 : i32
    return %c0_i32, %c0_i32_0 : i32, i32
  }
  func.func @transform_5(%arg0: i32, %arg1: i32) -> (i32, i32) {
    %c0_i32 = arith.constant 0 : i32
    %c0_i32_0 = arith.constant 0 : i32
    %c0_i32_1 = arith.constant 0 : i32
    return %c0_i32, %c0_i32_0 : i32, i32
  }
  func.func @transform_6(%arg0: i32, %arg1: i32) -> i32 {
    %c0_i32 = arith.constant 0 : i32
    %c0_i32_0 = arith.constant 0 : i32
    return %c0_i32 : i32
  }
  func.func @transform_7(%arg0: i32, %arg1: i32) -> (i32, i32, i32) {
    %c0_i32 = arith.constant 0 : i32
    %c0_i32_0 = arith.constant 0 : i32
    return %arg1, %arg0, %c0_i32 : i32, i32, i32
  }
  func.func @transform_8(%arg0: i32, %arg1: i32) -> (i32, i32, i32) {
    %c0_i32 = arith.constant 0 : i32
    %c0_i32_0 = arith.constant 0 : i32
    %c0_i32_1 = arith.constant 0 : i32
    return %arg0, %c0_i32, %c0_i32_0 : i32, i32, i32
  }
}

</mosaic_0001>

<bundles_post_ra>
// kernel: tpu_custom_call.1
= control target key start
LH: loop header
LB: loop body
LE: loop exit
PB: predicated region body
PF: predicated region fallthrough
CT: control target
= control target key end

     0   :  { %s1450_s0 = inlined_call_operand.vmem [shape: f32[3,2,128], index: 0, kind: input, shape index: {}]   ;;  %s1451_s1 = inlined_call_operand.vmem [shape: f32[2,128], index: 1, kind: input, shape index: {}]   ;;  %s1452_s2 = inlined_call_operand.hbm [shape: f32[2,32,128], index: 2, kind: input, shape index: {}, may-alias: {2,8}]   ;;  %s1453_s3 = inlined_call_operand.vmem [shape: f32[128,128], index: 3, kind: input, shape index: {}]   ;;  %s1454_s4 = inlined_call_operand.hbm [shape: f32[32,128], index: 4, kind: input, shape index: {}]   ;;  %s1455_s5 = inlined_call_operand.vmem [shape: f32[1,128], index: 5, kind: input, shape index: {}]   ;;  %s1456_s6 = inlined_call_operand.<no memory space> [shape: f32[1], index: 6, kind: input, shape index: {}]   ;;  %s1457_s7 = inlined_call_operand.hbm [shape: f32[3,2,128], index: 7, kind: output, shape index: {0}]   ;;  %s1458_s8 = inlined_call_operand.hbm [shape: f32[2,32,128], index: 8, kind: output, shape index: {1}, may-alias: {2,8}]  }
   0x1   :  { %1460 = sst [smem:[#allocation19_spill]] %s1450_s0 }
   0x2   :  { %14 = sst [smem:[#allocation4]] %s1456_s6 }
   0x3   :  { %15 = vsyncpa [#allocation6], 0 }
   0x4   :  { %16 = vsyncpa [#allocation7], 0 }
   0x5   :  { %18 = vsyncpa [#allocation7 + $0x1], 0 }
   0x6   :  { %19 = vsyncpa [#allocation10], 0  ;;  %s1167_s29 = smov 0   ;;  %s1169_s30 = smov 0  }
   0x7   :  { %s1171_s9 = smov 0   ;;  %s1173_s10 = smov 0  }
   0x8   :  { %s1175_s11 = smov 0   ;;  %s1177_s12 = smov 0  }
   0x9 LB: > { %s786_s6 = sadd.s32 4294967295, %s1106_s12   ;;  %s787_s13 = sadd.s32 4294967294, %s1106_s12   ;;  %s1106_s12 = sphi %s1177_s12, %s25_s12   ;;  %s1102_s11 = sphi %s1175_s11, %s1473_s11   ;;  %s1098_s10 = sphi %s1173_s10, %s1472_s10   ;;  %s1094_s9 = sphi %s1171_s9, %s1471_s9   ;;  %s1090_s30 = sphi %s1169_s30, %s1470_s30   ;;  %s1086_s29 = sphi %s1167_s29, %s1469_s29  }
   0xa   : > { %s34_s14 = sadd.s32 1, %s1102_s11  ;;  %s184_s15 = sadd.s32 1, %s1094_s9 }
   0xb   : > { %p35_p0 = scmp.ge.s32.totalorder %s34_s14, 3  ;;  %p194_p1 = scmp.ne.s32.totalorder %s1094_s9, %s1090_s30 }
   0xc   : > { %p1203_p2 = scmp.eq.s32.totalorder %s786_s6, 2  ;;  %p200_p3 = scmp.ne.s32.totalorder %s1090_s30, %s1086_s29 }
   0xd   : > { %s1475_s14 = smov (%p35_p0, %s34_s14), 0  ;;  %p201_p5 = scmp.eq.s32.totalorder %s787_s13, 2 }
   0xe   : > { %p1213_p4 = por %p1203_p2, %p194_p1  ;;  %s179_s18 = ssub.s32 %s1102_s11, %s1475_s14 }
   0xf   : > { %p788_p6 = scmp.ge.s32.totalorder %s1106_s12, 1  ;;  %p182_p7 = scmp.eq.s32.totalorder %s179_s18, 0 }
  0x10   : > { %p1220_p8 = por %p201_p5, %p200_p3  ;;  %p234_p9 = scmp.lt.s32.totalorder %s1106_s12, 4 }
  0x11   : > { %s1226_s20 = scalar_select %p182_p7, %s1094_s9, %s184_s15  }
  0x12   : > { %s1463_s19 = scalar_select %p1220_p8, 1, 0 }
  0x13   : > { %p1228_p10 = pnand %p788_p6, %p234_p9  ;;  %p1232_p11 = scmp.eq.s32.totalorder %s786_s6, 0 }
  0x14   : > { %s1108_s23 = smov [#allocation5]  }
  0x15   : > { %p875_p12 = pneg %p1228_p10  ;;  %s256_s24 = sshll.u32 %s1108_s23, 4  ;;  %s257_s24 = int_to_ptr.vmem [resolvable:$true] %s256_s24 }
  0x16   : > { %s961_s25 = scalar_lea.vmem %s257_s24, 512  ;;  %p969_p6 = scmp.lt.s32.totalorder %s257_s24, %s257_s24 }
  0x17   : > { %p876_p13 = pnand %p1232_p11, %p875_p12  ;;  %p962_p1 = scmp.ne.s32.totalorder %s257_s24, %s961_s25 }
  0x18   : > { %p970_p7 = scmp.lt.s32.totalorder %s961_s25, %s961_s25 }
  0x19   : > { %p952_p0 = pneg %p876_p13 }
  0x1a   : > { %p971_p9 = por %p970_p7, %p969_p6 }
  0x1b   : > { %p964_p3 = pnand %p962_p1, %p952_p0 }
  0x1d   : > { %p965_p5 = pneg %p964_p3 }
  0x1f   : > { %p972_p8 = pnand %p971_p9, %p965_p5 }
  0x21   : > { %975 = shalt.err (!%p972_p8)
}
  0x22   : > { %s1109_s26 = smov 128   ;;  %s1110_s27 = smov 8  }
  0x23   : > { %878 = dma.hbm_to_vmem [thread:$0]  (!%p876_p13), %s1454_s4, 512, %s257_s24, [#allocation6], %s1109_s26, %s1109_s26, %s1110_s27  }
  0x24   : > { %288 = sbr.rel (%p1228_p10) target bundleno = 485 (0x1e5), region = 44 }
  0x29   : > { %1071 = dma.done.wait (%p1232_p11), [#allocation6], 512  }
  0x2a   : > { %1073 = vsyncadd (%p1232_p11), [#allocation6], 4294966784  ;;  %s1459_s13 = sand.u32 1, %s1090_s30   ;;  %p326_p8 = scmp.lt.s32.totalorder %s1098_s10, 2 }
  0x2b   : > { %s1253_s15 = sshll.u32 %s1459_s13, 1  ;;  %s1466_s0 = sld [smem:[#allocation19_spill]] }
  0x2c   : > { %s327_s18 = scalar_select %p326_p8, %s1098_s10, 2 }
  0x2d   : > { %s323_s26 = scalar_lea.vmem [#allocation8], %s1253_s15  ;;  %p796_p10 = scmp.ne.s32.totalorder %s1098_s10, 0 }
  0x2e   : > { %s795_s23 = sshll.u32 %s327_s18, 1  ;;  %s1111_s28 = smov (!%p796_p10), [#allocation9]  }
  0x2f   : > { %341 = sbr.rel (%p796_p10) target bundleno = 60 (0x3c), region = 52  ;;  %s355_s6 = sshll.u32 (!%p796_p10), %s1111_s28, 4  ;;  %s356_s6 = int_to_ptr.vmem [resolvable:$true] %s355_s6 }
  0x30   : > { %s984_s13 = scalar_lea.vmem (!%p796_p10), %s356_s6, 1024  ;;  %p989_p12 = scmp.lt.s32.totalorder (!%p796_p10), %s356_s6, %s356_s6 }
  0x31   : > { %s1259_s25 = scalar_lea.vmem %s1466_s0, %s795_s23  ;;  %p985_p11 = scmp.ne.s32.totalorder (!%p796_p10), %s356_s6, %s984_s13 }
  0x32   : > { %p990_p13 = scmp.lt.s32.totalorder (!%p796_p10), %s984_s13, %s984_s13 }
  0x34   : > { %v342_v0 = vld [vmem:[%s1451_s1] sm:$0x3]  ;;  %p991_p0 = por %p990_p13, %p989_p12 }
  0x35   : > { %343 = vst [vmem:[#allocation2] sm:$0x3] %v342_v0 }
  0x36   : > { %p992_p1 = pnand %p991_p0, %p985_p11 }
  0x38   : > { %995 = shalt.err (!%p992_p1)  }
  0x39   : > { %358 = dma.hbm_to_vmem [thread:$0]  %s1452_s2, 1024, %s356_s6, [#allocation3] }
  0x3a   : > { %1074 = dma.done.wait [#allocation3], 1024 }
  0x3b   : > { %1075 = vsyncadd [#allocation3], 4294966272 }
  0x3c PF: > { %v387_v1 = vld [vmem:[%s1453_s3 + $0x78] sm:$0xff]  ;;  %v458_v2 = vlaneseq  ;;  %v1112_v3 = vmov 0.0   ;;  %v386_v4 = vld [vmem:[%s1453_s3 + $0x70] sm:$0xff]  ;;  %vm1113_vm0 = vmmov 0   ;;  %v385_v6 = vld [vmem:[%s1453_s3 + $0x68] sm:$0xff]  ;;  %vm538_vm1 = vcmask 1041409  }
  0x3d   : > { %830 = vmatprep.subr.mxu0 %v1112_v3  ;;  %862 = vmatprep.mubr.msk.f32.mxu0 %vm1113_vm0, %v1112_v3  ;;  %v384_v9 = vld [vmem:[%s1453_s3 + $0x60] sm:$0xff]  ;;  %v383_v13 = vld [vmem:[%s1453_s3 + $0x58] sm:$0xff]  ;;  %v382_v14 = vld [vmem:[%s1453_s3 + $0x50] sm:$0xff]  ;;  %vm551_vm2 = vcmask 1041408   ;;  %s650_s24 = sshll.u32 %s323_s26, 4  ;;  %s1467_s22 = sand.u32 1, %s1090_s30   ;;  %s651_s24 = int_to_ptr.vmem [resolvable:$true] %s650_s24 }
  0x3e   : > { %831 = vmatpush3.msra.mxu0 %v387_v1  ;;  %v1275_v5 = vshrl.u32 %v458_v2, 7  ;;  %v363_v10 = vld [vmem:[#allocation2] sm:$0x3]  ;;  %v381_v15 = vld [vmem:[%s1453_s3 + $0x48] sm:$0xff]  ;;  %v379_v17 = vld [vmem:[%s1453_s3 + $0x38] sm:$0xff]  ;;  %s636_s27 = scalar_lea.sflag [#allocation7], %s1467_s22 }
  0x3f   : > { %832 = vmatprep.subr.mxu0 %v1112_v3  ;;  %v380_v16 = vld [vmem:[%s1453_s3 + $0x40] sm:$0xff]  ;;  %v378_v18 = vld [vmem:[%s1453_s3 + $0x30] sm:$0xff]  ;;  %v377_v19 = vld [vmem:[%s1453_s3 + $0x28] sm:$0xff]  ;;  %s996_s13 = scalar_lea.vmem %s651_s24, 32  ;;  %s1114_s28 = smov [#allocation8]  }
  0x40   : > { %833 = vmatpush3.msra.mxu0 %v386_v4  ;;  %v479_v7 = vsub.s32 1, %v1275_v5  ;;  %v1282_v8 = vsub.s32 0, %v1275_v5  ;;  %v376_v20 = vld [vmem:[%s1453_s3 + $0x20] sm:$0xff]  ;;  %v375_v21 = vld [vmem:[%s1453_s3 + $0x18] sm:$0xff]  ;;  %v374_v22 = vld [vmem:[%s1453_s3 + $0x10] sm:$0xff]  ;;  %p997_p3 = scmp.ne.s32.totalorder %s651_s24, %s996_s13  ;;  %s1000_s6 = sshll.u32 %s1114_s28, 4  ;;  %s1001_s6 = int_to_ptr.vmem [resolvable:$false] %s1000_s6 }
  0x41   : > { %834 = vmatprep.subr.mxu0 %v1112_v3  ;;  %v373_v23 = vld [vmem:[%s1453_s3 + $0x8] sm:$0xff]  ;;  %v372_v24 = vld [vmem:[%s1453_s3] sm:$0xff]  ;;  %v1344_v39 = vld [vmem:[#allocation9 + $0x30] sm:$0xff]  ;;  %s1002_s0 = scalar_lea.vmem %s1001_s6, 64  ;;  %p1003_p7 = scmp.lt.s32.totalorder %s651_s24, %s1001_s6 }
  0x42   : > { %835 = vmatpush3.msra.mxu0 %v385_v6  ;;  %v480_v11 = vrot.slane %v363_v10, %v479_v7  ;;  %v461_v12 = vrot.slane %v363_v10, %v1282_v8  ;;  %v1328_v27 = vld [vmem:[#allocation9 + $0x20] sm:$0xff]  ;;  %v1332_v30 = vld [vmem:[#allocation9 + $0x28] sm:$0xff]  ;;  %v1346_v41 = vld [vmem:[#allocation9 + $0x10] sm:$0xff]  ;;  %p998_p5 = pnand %p997_p3, %p1213_p4  ;;  %p1004_p9 = scmp.lt.s32.totalorder %s1002_s0, %s996_s13 }
  0x43   : > { %836 = vmatprep.subr.mxu0 %v1112_v3  ;;  %v496_v28 = vld [vmem:[#allocation5] sm:$0xff]  ;;  %v497_v31 = vld [vmem:[#allocation5 + $0x8] sm:$0xff]  ;;  %v498_v40 = vld [vmem:[#allocation5 + $0x10] sm:$0xff] }
  0x44   : > { %837 = vmatpush3.msra.mxu0 %v384_v9  ;;  %482 = vbcast.lane.b32.xlu1 %v480_v11, 256  ;;  %v1330_v29 = vld [vmem:[#allocation9] sm:$0xff]  ;;  %v1336_v33 = vld [vmem:[#allocation9 + $0x8] sm:$0xff]  ;;  %v504_v35 = vmul.f32 %v496_v28, %v1328_v27  ;;  %v505_v37 = vmul.f32 %v497_v31, %v1332_v30  ;;  %v506_v42 = vmul.f32 %v498_v40, %v1344_v39  ;;  %v1358_v50 = vld [vmem:[#allocation9 + $0x38] sm:$0xff]  ;;  %p999_p6 = pneg %p998_p5  ;;  %p1005_p8 = por %p1004_p9, %p1003_p7 }
  0x45   : > { %838 = vmatprep.subr.mxu0 %v1112_v3  ;;  %463 = vbcast.lane.b32.xlu0 %v461_v12, 256  ;;  %v500_v36 = vmul.f32 %v496_v28, %v1330_v29  ;;  %v501_v38 = vmul.f32 %v497_v31, %v1336_v33  ;;  %v502_v44 = vmul.f32 %v498_v40, %v1346_v41  ;;  %v499_v51 = vld [vmem:[#allocation5 + $0x18] sm:$0xff] }
  0x46   : > { %839 = vmatpush3.msra.mxu0 %v383_v13  ;;  %v1360_v52 = vld [vmem:[#allocation9 + $0x18] sm:$0xff]  ;;  %v507_v53 = vmul.f32 %v499_v51, %v1358_v50  ;;  %p1006_p10 = pnand %p1005_p8, %p999_p6 }
  0x47   : > { %840 = vmatprep.subr.mxu0 %v1112_v3  ;;  %v503_v54 = vmul.f32 %v499_v51, %v1360_v52 }
  0x48   : > { %841 = vmatpush3.msra.mxu0 %v382_v14  ;;  %486 = vbcast.lane.b32.xlu1 %v480_v11, 264 }
  0x49   : > { %842 = vmatprep.subr.mxu0 %v1112_v3  ;;  %467 = vbcast.lane.b32.xlu0 %v461_v12, 264 }
  0x4a   : > { %843 = vmatpush3.msra.mxu0 %v381_v15 }
  0x4b   : > { %844 = vmatprep.subr.mxu0 %v1112_v3 }
  0x4c   : > { %845 = vmatpush3.msra.mxu0 %v380_v16  ;;  %490 = vbcast.lane.b32.xlu1 %v480_v11, 272 }
  0x4d   : > { %846 = vmatprep.subr.mxu0 %v1112_v3  ;;  %471 = vbcast.lane.b32.xlu0 %v461_v12, 272 }
  0x4e   : > { %847 = vmatpush3.msra.mxu0 %v379_v17  ;;  %v534_v17 = vld [vmem:[%s1259_s25] sm:$0x3]  ;;  %s807_s25 = sshll.u32 %s1098_s10, 5 }
  0x4f   : > { %848 = vmatprep.subr.mxu0 %v1112_v3  ;;  %s648_s21 = scalar_lea.hbm %s1457_s7, %s807_s25 }
  0x50   : > { %849 = vmatpush3.msra.mxu0 %v378_v18  ;;  %494 = vbcast.lane.b32.xlu1 %v480_v11, 280 }
  0x51   : > { %850 = vmatprep.subr.mxu0 %v1112_v3  ;;  %475 = vbcast.lane.b32.xlu0 %v461_v12, 280 }
  0x52   : > { %851 = vmatpush3.msra.mxu0 %v377_v19 }
  0x53   : > { %852 = vmatprep.subr.mxu0 %v1112_v3 }
  0x54   : > { %853 = vmatpush3.msra.mxu0 %v376_v20 }
  0x55   : > { %854 = vmatprep.subr.mxu0 %v1112_v3 }
  0x56   : > { %855 = vmatpush3.msra.mxu0 %v375_v21 }
  0x57   : > { %856 = vmatprep.subr.mxu0 %v1112_v3 }
  0x58   : > { %857 = vmatpush3.msra.mxu0 %v374_v22 }
  0x59   : > { %858 = vmatprep.subr.mxu0 %v1112_v3 }
  0x5a   : > { %859 = vmatpush3.msra.mxu0 %v373_v23  ;;  %v797_v23 = vld [vmem:[%s1455_s5] ss:$0 sm:$0xff] }
  0x5b   : > { %860 = vmatprep.subr.mxu0 %v1112_v3 }
  0x5c   : > { %861 = vmatpush3.msra.mxu0 %v372_v24 }
  0x5d   : > { %863 = vmatmul.mubr.f32.vlgmr.msra.gmra.mxu0 %v363_v10 }
  0xb6   : > { %v1324_v25 = vpop.permute.xlu1 %482 }
  0xb7   : > { %v1326_v26 = vpop.permute.xlu0 %463  ;;  %v512_v46 = vmul.f32 %v504_v35, %v1324_v25 }
  0xb8   : > { %v508_v47 = vmul.f32 %v500_v36, %v1326_v26 }
  0xba   : > { %v1334_v32 = vpop.permute.xlu1 %486 }
  0xbb   : > { %v1338_v34 = vpop.permute.xlu0 %467  ;;  %v513_v48 = vmul.f32 %v505_v37, %v1334_v32 }
  0xbc   : > { %v509_v49 = vmul.f32 %v501_v38, %v1338_v34 }
  0xbd   : > { %v525_v55 = vadd.f32 %v513_v48, %v512_v46 }
  0xbe   : > { %v1349_v43 = vpop.permute.xlu1 %490  ;;  %v516_v56 = vadd.f32 %v509_v49, %v508_v47 }
  0xbf   : > { %v1352_v45 = vpop.permute.xlu0 %471  ;;  %v514_v57 = vmul.f32 %v506_v42, %v1349_v43 }
  0xc0   : > { %v510_v58 = vmul.f32 %v502_v44, %v1352_v45 }
  0xc1   : > { %v526_v61 = vadd.f32 %v525_v55, %v514_v57 }
  0xc2   : > { %v1366_v59 = vpop.permute.xlu1 %494  ;;  %v517_v62 = vadd.f32 %v516_v56, %v510_v58 }
  0xc3   : > { %v1368_v60 = vpop.permute.xlu0 %475  ;;  %v515_v63 = vmul.f32 %v507_v53, %v1366_v59 }
  0xc4   : > { %v511_v0 = vmul.f32 %v503_v54, %v1368_v60 }
  0xc5   : > { %v527_v1 = vadd.f32 %v526_v61, %v515_v63 }
  0xc6   : > { %v518_v2 = vadd.f32 %v517_v62, %v511_v0 }
  0xc7   : > { %v528_v3 = vrot.slane %v527_v1, 4 }
  0xc8   : > { %v519_v4 = vrot.slane %v518_v2, 4 }
  0xc9   : > { %v529_v6 = vadd.f32 %v528_v3, %v527_v1 }
  0xca   : > { %v520_v7 = vadd.f32 %v519_v4, %v518_v2 }
  0xcb   : > { %v530_v9 = vrot.slane %v529_v6, 2 }
  0xcc   : > { %v521_v10 = vrot.slane %v520_v7, 2 }
  0xcd   : > { %v531_v11 = vadd.f32 %v530_v9, %v529_v6 }
  0xce   : > { %v522_v12 = vadd.f32 %v521_v10, %v520_v7 }
  0xcf   : > { %v532_v13 = vrot.slane %v531_v11, 1 }
  0xd0   : > { %v523_v14 = vrot.slane %v522_v12, 1 }
  0xd1   : > { %v533_v16 = vadd.f32 %v532_v13, %v531_v11 }
  0xd2   : > { %v524_v15 = vadd.f32 %v523_v14, %v522_v12 }
  0xd4   : > { %v539_v20 = vsel %vm538_vm1, %v533_v16, %v524_v15 }
 0x11d   : > { %v454_v18 = vpop.f32.mrf.mxu0 }
 0x11e   : > { %v535_v19 = vadd.f32 %v534_v17, %v454_v18 }
 0x11f   : > { %v864_v21 = vpop.f32.mrf.mxu0 }
 0x120   : > { %v541_v22 = vadd.f32 %v539_v20, %v535_v19 }
 0x122   : > { %946 = vtanh.f32 %v541_v22 }
 0x12f   : > { %v947_v24 = vpop.eup %946 }
 0x130   : > { %634 = vst [vmem:[#allocation2] sm:$0x3] %v947_v24  ;;  %633 = vst [vmem:[%s323_s26] sm:$0x3] %v947_v24  ;;  %v550_v28 = vmul.f32 %v947_v24, %v797_v23 }
 0x132   : > { %v552_v31 = vsel %vm551_vm2, %v550_v28, 0.0 }
 0x133   : > { %553 = vadd.xlane.f32.xlu0 %v552_v31 }
 0x134   : > { %1009 = shalt.err (!%p1006_p10)
}
 0x135   : > { %s1010_s10 = scalar_lea.hbm %s648_s21, 32  ;;  %s1014_s25 = scalar_lea.hbm %s1457_s7, 96 }
 0x136   : > { %p1011_p11 = scmp.ne.s32.totalorder %s648_s21, %s1010_s10  ;;  %p1015_p0 = scmp.lt.s32.totalorder %s648_s21, %s1457_s7 }
 0x137   : > { %p1016_p1 = scmp.lt.s32.totalorder %s1014_s25, %s1010_s10 }
 0x138   : > { %p1012_p12 = pnand %p1011_p11, %p1213_p4 }
 0x139   : > { %p1017_p3 = por %p1016_p1, %p1015_p0 }
 0x13a   : > { %p1013_p13 = pneg %p1012_p12 }
 0x13c   : > { %p1018_p5 = pnand %p1017_p3, %p1013_p13 }
 0x13e   : > { %1021 = shalt.err (!%p1018_p5)
}
 0x13f   : > { %869 = dma.vmem_to_hbm [thread:$0]  (%p1213_p4), %s651_s24, 32, %s648_s21, %s636_s27   ;;  %v1115_v38 = vmov 1966171168  }
 0x140   : > { %s555_s0 = sld [smem:[#allocation4]]  ;;  %v562_v40 = vunpack.c.l.s4 %v1115_v38  ;;  %s1116_s17 = smov [#allocation9]  }
 0x141   : > { %s664_s21 = sshll.u32 %s1116_s17, 4  ;;  %s665_s21 = int_to_ptr.vmem [resolvable:$true] %s664_s21 }
 0x142   : > { %v563_v42 = vunpack.c.0.s8 %v562_v40  ;;  %s1022_s24 = scalar_lea.vmem %s665_s21, 1024  ;;  %p1029_p9 = scmp.lt.s32.totalorder %s665_s21, %s665_s21 }
 0x143   : > { %p1023_p4 = scmp.ne.s32.totalorder %s665_s21, %s1022_s24  ;;  %p1030_p8 = scmp.lt.s32.totalorder %s1022_s24, %s1022_s24 }
 0x144   : > { %v566_v44 = vsub.s32 %v563_v42, %v1275_v5 }
 0x145   : > { %p1024_p6 = pnand %p1023_p4, %p1203_p2  ;;  %p1031_p10 = por %p1030_p8, %p1029_p9 }
 0x146   : > { %v556_v35 = vstv %s555_s0 }
 0x147   : > { %p1025_p7 = pneg %p1024_p6 }
 0x149   : > { %p1032_p11 = pnand %p1031_p10, %p1025_p7 }
 0x1bc   : > { %v554_v36 = vpop.xlane.xlu0 %553 }
 0x1bd   : > { %v557_v37 = vadd.f32 %v556_v35, %v554_v36 }
 0x1bf   : > { %948 = vtanh.f32 %v557_v37 }
 0x1cc   : > { %v949_v46 = vpop.eup %948 }
 0x1cd   : > { %v559_v47 = vmul.f32 %v949_v46, %v947_v24 }
 0x1cf   : > { %v567_v48 = vrot.slane %v559_v47, %v566_v44 }
 0x1d1   : > { %v568_v49 = vcombine.high %v567_v48, %v567_v48  ;;  %v575_v51 = vrot.slane %v567_v48, %v566_v44 }
 0x1d3   : > { %v582_v53 = vrot.slane %v568_v49, %v566_v44  ;;  %v586_v54 = vrot.slane %v575_v51, %v1282_v8 }
 0x1d5   : > { %v590_v55 = vrot.slane %v582_v53, %v1282_v8  ;;  %v593_v56 = vmul.f32 %v586_v54, %v1326_v26  ;;  %v594_v57 = vmul.f32 %v586_v54, %v1338_v34  ;;  %v595_v58 = vmul.f32 %v586_v54, %v1352_v45 }
 0x1d6   : > { %v596_v61 = vmul.f32 %v586_v54, %v1368_v60 }
 0x1d7   : > { %v597_v5 = vmul.f32 %v590_v55, %v1324_v25  ;;  %v598_v62 = vmul.f32 %v590_v55, %v1334_v32  ;;  %v599_v63 = vmul.f32 %v590_v55, %v1349_v43  ;;  %v600_v0 = vmul.f32 %v590_v55, %v1366_v59 }
 0x1d8   : > { %v601_v1 = vadd.f32 %v593_v56, %v1330_v29  ;;  %v602_v8 = vadd.f32 %v594_v57, %v1336_v33  ;;  %v603_v26 = vadd.f32 %v595_v58, %v1346_v41  ;;  %v604_v34 = vadd.f32 %v596_v61, %v1360_v52 }
 0x1d9   : > { %v605_v45 = vadd.f32 %v597_v5, %v1328_v27  ;;  %v606_v25 = vadd.f32 %v598_v62, %v1332_v30  ;;  %v607_v32 = vadd.f32 %v599_v63, %v1344_v39  ;;  %v608_v43 = vadd.f32 %v600_v0, %v1358_v50 }
 0x1da   : > { %v798_v60 = vclamps-f32 %v601_v1, 1.0  ;;  %v799_v59 = vclamps-f32 %v602_v8, 1.0  ;;  %v800_v2 = vclamps-f32 %v603_v26, 1.0  ;;  %v801_v29 = vclamps-f32 %v604_v34, 1.0 }
 0x1db   : > { %v802_v33 = vclamps-f32 %v605_v45, 1.0  ;;  %v803_v3 = vclamps-f32 %v606_v25, 1.0  ;;  %v804_v41 = vclamps-f32 %v607_v32, 1.0  ;;  %v805_v4 = vclamps-f32 %v608_v43, 1.0 }
 0x1dc   : > { %625 = vst [vmem:[#allocation9] sm:$0xff] %v798_v60  ;;  %626 = vst [vmem:[#allocation9 + $0x8] sm:$0xff] %v799_v59 }
 0x1dd   : > { %627 = vst [vmem:[#allocation9 + $0x10] sm:$0xff] %v800_v2  ;;  %628 = vst [vmem:[#allocation9 + $0x18] sm:$0xff] %v801_v29 }
 0x1de   : > { %629 = vst [vmem:[#allocation9 + $0x20] sm:$0xff] %v802_v33  ;;  %630 = vst [vmem:[#allocation9 + $0x28] sm:$0xff] %v803_v3 }
 0x1df   : > { %631 = vst [vmem:[#allocation9 + $0x30] sm:$0xff] %v804_v41  ;;  %632 = vst [vmem:[#allocation9 + $0x38] sm:$0xff] %v805_v4 }
 0x1e0   : > { %1035 = shalt.err (!%p1032_p11)
}
 0x1e1   : > { %s1117_s22 = smov 128   ;;  %s1118_s27 = smov 8  }
 0x1e2   : > { %871 = dma.vmem_to_hbm [thread:$0]  (%p1203_p2), %s665_s21, 1024, %s1458_s8, [#allocation10], %s1117_s22, %s1117_s22, %s1118_s27  }
 0x1e3   : > { %1077 = dma.done.wait (%p1203_p2), [#allocation10], 1024  }
 0x1e4   : > { %1079 = vsyncadd (%p1203_p2), [#allocation10], 4294966272 }
 0x1e5 PF: > { %p887_p12 = scmp.ge.s32.totalorder %s1106_s12, 2  ;;  %s683_s6 = sand.u32 1, %s1086_s29  }
 0x1e6   : > { %p1468_p13 = scmp.ne.s32.totalorder %s1463_s19, 0  ;;  %s684_s10 = scalar_lea.sflag [#allocation7], %s683_s6 }
 0x1e8   : > { %p880_p0 = pnand %p887_p12, %p1468_p13 }
 0x1ea   : > { %p881_p1 = pneg %p880_p0 }
 0x1ec   : > { %1081 = dma.done.wait (%p881_p1), %s684_s10, 32  }
 0x1ed   : > { %1083 = vsyncadd (%p881_p1), %s684_s10, 4294967264  ;;  %s25_s12 = sadd.s32 1, %s1106_s12   ;;  %s1469_s29 = smov %s1090_s30 }
 0x1ee   : > { %p22_p3 = scmp.ge.s32.totalorder %s25_s12, 5   ;;  %s1470_s30 = smov %s1094_s9 }
 0x1ef   : > { %s1471_s9 = smov %s1226_s20  ;;  %s1472_s10 = smov %s1102_s11 }
 0x1f0   : > { %s1473_s11 = smov %s1475_s14  ;;  %24 = sbr.rel (!%p22_p3) target bundleno = 9 (0x9), region = 105 }
 0x1f5   :  { %689 = vsyncpa [#allocation6], 1 }
 0x1f6   :  { %691 = vsyncpa [#allocation6 + $0x1], 1 }
 0x1f7   :  { %692 = vsyncpa [#allocation7], 1 }
 0x1f8   :  { %694 = vsyncpa [#allocation7 + $0x1], 1 }
 0x1f9   :  { %695 = vsyncpa [#allocation10], 1 }
 0x1fa   :  { %696 = vsyncmov [#allocation3] }
 0x1fd   :  { %s697_s16 = vpop.sfrf %696 }
 0x1fe   :  { %p812_p2 = scmp.ne.s32.totalorder %s697_s16, 0 }
 0x200   :  { %701 = shalt.err (%p812_p2)  }

</bundles_post_ra>
